<compile_context>
chip_gen: v5e
topology: v5e:2x2
jax: 0.10.0
libtpu: 0.0.40
codegen_flags: <defaults>
</compile_context>

<pallas_src>
import jax
import jax.numpy as jnp
from jax.experimental import pallas as pl
from jax.experimental.pallas import tpu as pltpu

_LANE = 128
_SUBLANE = 8


def _normalize_kernel(x_ref, sb_ref, o_ref):
    # x_ref : (block_rows, block_l) pixels (f32 or uint8; upcast here)
    # sb_ref: (block_rows, 2) f32   -- col 0 = scale, col 1 = bias
    # o_ref : (block_rows, block_l) output
    x = x_ref[...]
    if x.dtype != jnp.float32:
        x = x.astype(jnp.float32)          # in-kernel upcast (uint8 path)
    sb = sb_ref[...]
    scale = sb[:, 0:1]                     # (block_rows, 1) -> broadcast over lanes
    bias = sb[:, 1:2]
    # Compute in f32; cast only at the store (bf16 output safe on v5e too).
    o_ref[...] = (x * scale - bias).astype(o_ref.dtype)


def _round_up(a, b):
    return (a + b - 1) // b * b


def _pick_block(dim, align, cap):
    """Block size for one axis: a multiple of `align` <= cap, or the full dim."""
    if dim <= cap:
        b = _round_up(dim, align)
        # A rounded-up block would overhang a tiny dim; use the full-dim
        # exemption of the (8,128) rule instead.
        return dim if b > dim else b
    return cap  # cap is kept a multiple of align by the caller


def normalize(x, mean, std, *, out_dtype=jnp.float32,
              target_block_bytes=2 << 20, lane_cap=16384,
              donate_input=False):
    """Pallas TPU equivalent of the PyTorch Normalize module.

    x: [N, C, H, W] pixel values in [0, 255] (float32 or uint8).
    mean, std: length-C arrays. Returns `out_dtype` (default float32).
    """
    N, C, H, W = x.shape
    mean = jnp.asarray(mean, jnp.float32).reshape(C)
    std = jnp.asarray(std, jnp.float32).reshape(C)

    # (x/255 - m)/s == x * (1/(255*s)) - (m/s)
    scale = 1.0 / (255.0 * std)            # (C,)
    bias = mean / std                      # (C,)

    R, L = N * C, H * W
    x2 = x.reshape(R, L)                   # free row-major reshape; lane dim = H*W

    in_size = jnp.dtype(x.dtype).itemsize
    out_size = jnp.dtype(out_dtype).itemsize

    # Second-minor block alignment: 8 for 32-bit, 16 for 16-bit, 32 for 8-bit
    # (sublane packing), unless the block equals the full dim.
    row_align = _SUBLANE * (4 // min(in_size, out_size))

    # Lane block: large multiple of 128 -> long DMA rows, unmasked stores.
    block_l = _pick_block(L, _LANE, lane_cap)
    # Row block: fill ~target_block_bytes, counted on the wider of in/out dtype.
    max_rows = max(row_align,
                   target_block_bytes // (block_l * max(in_size, out_size)))
    max_rows = (max_rows // row_align) * row_align
    block_rows = _pick_block(R, row_align, max_rows)

    # v7x has 2 TensorCores: make sure a "parallel" axis has >= 2 blocks so the
    # whole chip (and its full HBM bandwidth) is used.
    def n_blocks(br, bl):
        return pl.cdiv(R, br) * pl.cdiv(L, bl)

    while n_blocks(block_rows, block_l) < 2:
        if block_l >= 2 * _LANE:
            block_l = _round_up(pl.cdiv(block_l, 2), _LANE)
        elif block_rows >= 2 * row_align:
            block_rows = _round_up(pl.cdiv(block_rows, 2), row_align)
        else:
            break  # input too tiny to split legally; one block is fine

    grid = (pl.cdiv(R, block_rows), pl.cdiv(L, block_l))

    # Per-row (per N*C) scale/bias packed as one (R_pad, 2) array: a single
    # tiny DMA per row-block; lane axis is innermost so it is not re-fetched.
    r_pad = grid[0] * block_rows
    sb = jnp.stack([jnp.tile(scale, N), jnp.tile(bias, N)], axis=1)  # (R, 2)
    if r_pad > R:
        pad = jnp.broadcast_to(jnp.array([1.0, 0.0], jnp.float32), (r_pad - R, 2))
        sb = jnp.concatenate([sb, pad], axis=0)

    # VMEM actually needed (double-buffered in + out + sb), not a blanket cap.
    in_blk = block_rows * block_l * in_size
    out_blk = block_rows * block_l * out_size
    sb_blk = block_rows * _LANE * 4                  # lane-padded
    vmem_limit = int(2 * (in_blk + out_blk + sb_blk) + (4 << 20))

    aliases = {}
    if donate_input and jnp.dtype(x.dtype) == jnp.dtype(out_dtype):
        aliases = {0: 0}   # reuse x's HBM buffer for the output (caller opts in)

    out2 = pl.pallas_call(
        _normalize_kernel,
        out_shape=jax.ShapeDtypeStruct((R, L), out_dtype),
        grid_spec=pl.GridSpec(
            grid=grid,
            in_specs=[
                pl.BlockSpec((block_rows, block_l), lambda r, l: (r, l)),
                pl.BlockSpec((block_rows, 2), lambda r, l: (r, 0)),
            ],
            out_specs=pl.BlockSpec((block_rows, block_l), lambda r, l: (r, l)),
        ),
        compiler_params=pltpu.CompilerParams(
            dimension_semantics=("parallel", "parallel"),
            vmem_limit_bytes=vmem_limit,
        ),
        input_output_aliases=aliases,
    )(x2, sb)

    return out2.reshape(N, C, H, W)


if __name__ == "__main__":
    key = jax.random.PRNGKey(0)
    k1, k2, k3 = jax.random.split(key, 3)

    # Buffers as registered in the module's __init__ (C = 3, hardcoded).
    mean = jnp.array([0.485, 0.456, 0.406], dtype=jnp.float32)
    std = jnp.array([0.229, 0.224, 0.225], dtype=jnp.float32)

    def ref_fn(xf):
        return ((xf.astype(jnp.float32) / 255.0 - mean.reshape(1, 3, 1, 1))
                / std.reshape(1, 3, 1, 1))

    # 1) float32 pixels, small "nice" shape.
    x1 = jax.random.uniform(k1, (2, 3, 16, 16), jnp.float32, 0.0, 255.0)
    o1 = jax.block_until_ready(normalize(x1, mean, std))
    assert o1.dtype == jnp.float32
    assert jnp.allclose(o1, ref_fn(x1), atol=1e-5, rtol=1e-5), "f32 mismatch"

    # 2) awkward spatial size -> exercises the cdiv grid / masked boundary block.
    x2 = jax.random.uniform(k2, (2, 3, 17, 25), jnp.float32, 0.0, 255.0)
    o2 = jax.block_until_ready(normalize(x2, mean, std))
    assert jnp.allclose(o2, ref_fn(x2), atol=1e-5, rtol=1e-5), "boundary mismatch"

    # 3) uint8 pixel input (upcast to f32 inside the kernel; 4x fewer read bytes).
    x3 = jax.random.randint(k3, (2, 3, 16, 16), 0, 256, dtype=jnp.int32).astype(jnp.uint8)
    o3 = jax.block_until_ready(normalize(x3, mean, std))
    assert o3.dtype == jnp.float32
    assert jnp.allclose(o3, ref_fn(x3), atol=1e-5, rtol=1e-5), "uint8 mismatch"

    print("KERNEL_OK")
</pallas_src>

<mosaic_0001>
module attributes {stable_mosaic.version = 11 : i64} {
  func.func @_normalize_kernel(%arg0: i32, %arg1: i32, %arg2: memref<6x128xf32, #tpu.memory_space<vmem>>, %arg3: memref<6x2xf32, #tpu.memory_space<vmem>>, %arg4: memref<6x128xf32, #tpu.memory_space<vmem>>) attributes {dimension_semantics = [#tpu.dimension_semantics<parallel>, #tpu.dimension_semantics<parallel>], iteration_bounds = array<i64: 1, 2>, scalar_prefetch = 0 : i64, scratch_operands = 0 : i64, tpu.core_type = #tpu.core_type<tc>, window_params = [{transform_indices = @transform_0, window_bounds = array<i64: 6, 128>}, {transform_indices = @transform_1, window_bounds = array<i64: 6, 2>}, {transform_indices = @transform_2, window_bounds = array<i64: 6, 128>}]} {
    %c0 = arith.constant 0 : index
    %c0_0 = arith.constant 0 : index
    %0 = vector.load %arg2[%c0, %c0_0] : memref<6x128xf32, #tpu.memory_space<vmem>>, vector<6x128xf32>
    %c0_1 = arith.constant 0 : index
    %c0_2 = arith.constant 0 : index
    %1 = vector.load %arg3[%c0_1, %c0_2] : memref<6x2xf32, #tpu.memory_space<vmem>>, vector<6x2xf32>
    %2 = vector.extract_strided_slice %1 {offsets = [0, 0], sizes = [6, 1], strides = [1, 1]} : vector<6x2xf32> to vector<6x1xf32>
    %3 = vector.extract_strided_slice %1 {offsets = [0, 1], sizes = [6, 1], strides = [1, 1]} : vector<6x2xf32> to vector<6x1xf32>
    %4 = vector.broadcast %2 : vector<6x1xf32> to vector<6x128xf32>
    %5 = arith.mulf %0, %4 : vector<6x128xf32>
    %6 = vector.broadcast %3 : vector<6x1xf32> to vector<6x128xf32>
    %7 = arith.subf %5, %6 : vector<6x128xf32>
    %c0_3 = arith.constant 0 : index
    %c0_4 = arith.constant 0 : index
    %8 = vector.load %arg4[%c0_3, %c0_4] : memref<6x128xf32, #tpu.memory_space<vmem>>, vector<6x128xf32>
    tpu.vector_store %arg4[%c0_3, %c0_4], %7 {strides = array<i32>} : memref<6x128xf32, #tpu.memory_space<vmem>>, vector<6x128xf32>,
    return
  }
  func.func @transform_0(%arg0: i32, %arg1: i32) -> (i32, i32) {
    %c0_i32 = arith.constant 0 : i32
    return %arg0, %arg1 : i32, i32
  }
  func.func @transform_1(%arg0: i32, %arg1: i32) -> (i32, i32) {
    %c0_i32 = arith.constant 0 : i32
    %c0_i32_0 = arith.constant 0 : i32
    return %arg0, %c0_i32 : i32, i32
  }
  func.func @transform_2(%arg0: i32, %arg1: i32) -> (i32, i32) {
    %c0_i32 = arith.constant 0 : i32
    return %arg0, %arg1 : i32, i32
  }
}

</mosaic_0001>

<bundles_post_ra>
// kernel: tpu_custom_call.1
= control target key start
LH: loop header
LB: loop body
LE: loop exit
PB: predicated region body
PF: predicated region fallthrough
CT: control target
= control target key end

     0   :  { %7 = vsyncpa [#allocation3], 0  ;;  %s659_s0 = inlined_call_operand.hbm [shape: f32[6,256], index: 0, kind: input, shape index: {}]   ;;  %s660_s1 = inlined_call_operand.vmem [shape: f32[6,2], index: 1, kind: input, shape index: {}]   ;;  %s661_s2 = inlined_call_operand.hbm [shape: f32[6,256], index: 2, kind: output, shape index: {}]  }
   0x1   :  { %9 = vsyncpa [#allocation3 + $0x1], 0 }
   0x2   :  { %10 = vsyncpa [#allocation4], 0 }
   0x3   :  { %12 = vsyncpa [#allocation4 + $0x1], 0  ;;  %s536_s9 = smov 0   ;;  %s538_s10 = smov 0  }
   0x4   :  { %s540_s11 = smov 0   ;;  %s542_s12 = smov 0  }
   0x5   :  { %s544_s13 = smov 0   ;;  %s546_s14 = smov 0  }
   0x6 LB: > { %s325_s15 = sadd.s32 4294967295, %s517_s14   ;;  %s326_s16 = sadd.s32 4294967294, %s517_s14   ;;  %s517_s14 = sphi %s546_s14, %s18_s14   ;;  %s513_s13 = sphi %s544_s13, %s670_s13   ;;  %s509_s12 = sphi %s542_s12, %s669_s12   ;;  %s505_s11 = sphi %s540_s11, %s668_s11   ;;  %s501_s10 = sphi %s538_s10, %s667_s10   ;;  %s497_s9 = sphi %s536_s9, %s666_s9  }
   0x7   : > { %s27_s17 = sadd.s32 1, %s513_s13  ;;  %s39_s18 = sadd.s32 1, %s505_s11 }
   0x8   : > { %p28_p0 = scmp.ge.s32.totalorder %s27_s17, 2  ;;  %p46_p1 = scmp.ne.s32.totalorder %s505_s11, %s501_s10 }
   0x9   : > { %p47_p2 = scmp.eq.s32.totalorder %s517_s14, 0  ;;  %p52_p3 = scmp.ne.s32.totalorder %s501_s10, %s497_s9 }
   0xa   : > { %s672_s17 = smov (%p28_p0, %s27_s17), 0  ;;  %p53_p5 = scmp.eq.s32.totalorder %s325_s15, 0 }
   0xb   : > { %p577_p4 = por %p47_p2, %p46_p1  ;;  %s35_s20 = ssub.s32 %s513_s13, %s672_s17 }
   0xc   : > { %p104_p6 = scmp.eq.s32.totalorder %s325_s15, 1  ;;  %p37_p7 = scmp.eq.s32.totalorder %s35_s20, 0 }
   0xd   : > { %p583_p8 = por %p53_p5, %p52_p3  ;;  %p110_p10 = scmp.eq.s32.totalorder %s326_s16, 1 }
   0xe   : > { %p587_p9 = por %p104_p6, %p46_p1  ;;  %p329_p12 = scmp.ge.s32.totalorder %s517_s14, 2 }
   0xf   : > { %s592_s23 = scalar_select %p37_p7, %s505_s11, %s39_s18  }
  0x10   : > { %p594_p11 = por %p110_p10, %p52_p3  ;;  %p351_p13 = scmp.lt.s32.totalorder %s517_s14, 2 }
  0x11   : > { %s137_s25 = sand.u32 1, %s505_s11   ;;  %s331_s27 = sshll.u32 %s513_s13, 3 }
  0x12   : > { %s330_s26 = sshll.u32 %s137_s25, 3  ;;  %s147_s30 = scalar_lea.hbm %s659_s0, %s331_s27 }
  0x13   : > { %s141_s3 = scalar_lea.vmem [#allocation2], %s330_s26  ;;  %s149_s5 = sshll.u32 %s147_s30, 4  ;;  %s150_s5 = int_to_ptr.hbm [resolvable:$true] %s149_s5 }
  0x14   : > { %s151_s4 = sshll.u32 %s141_s3, 4  ;;  %p344_p0 = pnand %p351_p13, %p577_p4  ;;  %s152_s4 = int_to_ptr.vmem [resolvable:$true] %s151_s4 }
  0x15   : > { %p332_p1 = scmp.ge.s32.totalorder %s517_s14, 1  ;;  %p156_p2 = scmp.lt.s32.totalorder %s517_s14, 3 }
  0x16   : > { %s138_s6 = scalar_lea.sflag [#allocation3], %s137_s25 }
  0x17   : > { %346 = dma.hbm_to_vmem [thread:$0]  (!%p344_p0), %s150_s5, 128, %s152_s4, %s138_s6  }
  0x18   : > { %p157_p3 = pnand %p332_p1, %p156_p2 }
  0x19   : > { %s610_s7 = sand.u32 (!%p157_p3), 1, %s501_s10  }
  0x1a   : > { %160 = sbr.rel (%p157_p3) target bundleno = 163 (0xa3), region = 28  ;;  %s333_s8 = sshll.u32 (!%p157_p3), %s610_s7, 3 }
  0x1b   : > { %s163_s15 = scalar_lea.sflag (!%p157_p3), [#allocation3], %s610_s7  ;;  %s166_s16 = scalar_lea.vmem (!%p157_p3), [#allocation2], %s333_s8 }
  0x1f   : > { %488 = dma.done.wait (%p583_p8), %s163_s15, 128  }
  0x20   : > { %490 = vsyncadd (%p583_p8), %s163_s15, 4294967168  ;;  %v519_v0 = vmov 0   ;;  %v197_v1 = vld [vmem:[%s660_s1] sm:$0x3f]  ;;  %v520_v2 = vmov 1   ;;  %s336_s20 = sshll.u32 %s509_s12, 3 }
  0x21   : > { %403 = vset.pattern.permute.xlu0 %v519_v0  ;;  %s223_s27 = scalar_lea.hbm %s661_s2, %s336_s20  ;;  %v196_v4 = vld [vmem:[%s166_s16] sm:$0x3f]  ;;  %s191_s21 = scalar_lea.vmem [#allocation5], %s333_s8 }
  0x22   : > { %200 = vperm.xlu0 %403, %v197_v1   ;;  %s225_s28 = sshll.u32 %s191_s21, 4  ;;  %s227_s29 = sshll.u32 %s223_s27, 4  ;;  %s226_s28 = int_to_ptr.vmem [resolvable:$true] %s225_s28  ;;  %s228_s29 = int_to_ptr.hbm [resolvable:$true] %s227_s29 }
  0x23   : > { %s211_s30 = scalar_lea.sflag [#allocation4], %s610_s7  ;;  %s449_s3 = sshra.s32 %s228_s29, 4  ;;  %s450_s3 = int_to_ptr.hbm [resolvable:$true] %s449_s3 }
  0x24   : > { %s451_s4 = scalar_lea.hbm %s450_s3, 8  ;;  %s455_s6 = scalar_lea.hbm %s661_s2, 16 }
  0x25   : > { %p452_p4 = scmp.ne.s32.totalorder %s450_s3, %s451_s4  ;;  %p456_p7 = scmp.lt.s32.totalorder %s450_s3, %s661_s2 }
  0x26   : > { %p457_p8 = scmp.lt.s32.totalorder %s455_s6, %s451_s4 }
  0x27   : > { %p453_p5 = pnand %p452_p4, %p587_p9 }
  0x28   : > { %p458_p10 = por %p457_p8, %p456_p7 }
  0x29   : > { %p454_p6 = pneg %p453_p5 }
  0x2a   : > { %404 = vset.pattern.permute.xlu0 %v520_v2 }
  0x2b   : > { %205 = vperm.xlu0 %404, %v197_v1   ;;  %p459_p13 = pnand %p458_p10, %p454_p6 }
  0x94   : > { %v201_v3 = vpop.permute.xlu0 %200 }
  0x95   : > { %v203_v5 = vmul.f32 %v201_v3, %v196_v4 }
  0x9d   : > { %v206_v6 = vpop.permute.xlu0 %205 }
  0x9e   : > { %v208_v7 = vsub.f32 %v203_v5, %v206_v6 }
  0xa0   : > { %209 = vst [vmem:[%s191_s21] sm:$0x3f] %v208_v7 }
  0xa1   : > { %462 = shalt.err (!%p459_p13)
}
  0xa2   : > { %341 = dma.vmem_to_hbm [thread:$0]  (%p587_p9), %s226_s28, 128, %s228_s29, %s211_s30  }
  0xa3 PF: > { %s239_s7 = sand.u32 1, %s497_s9   ;;  %p348_p0 = pnand %p329_p12, %p594_p11 }
  0xa4   : > { %s240_s16 = scalar_lea.sflag [#allocation4], %s239_s7 }
  0xa5   : > { %p349_p1 = pneg %p348_p0 }
  0xa7   : > { %492 = dma.done.wait (%p349_p1), %s240_s16, 128  }
  0xa8   : > { %494 = vsyncadd (%p349_p1), %s240_s16, 4294967168  ;;  %s18_s14 = sadd.s32 1, %s517_s14   ;;  %s666_s9 = smov %s501_s10 }
  0xa9   : > { %p15_p2 = scmp.ge.s32.totalorder %s18_s14, 4   ;;  %s667_s10 = smov %s505_s11 }
  0xaa   : > { %s668_s11 = smov %s592_s23  ;;  %s669_s12 = smov %s513_s13 }
  0xab   : > { %s670_s13 = smov %s672_s17  ;;  %17 = sbr.rel (!%p15_p2) target bundleno = 6 (0x6), region = 76 }
  0xb0   :  { %246 = vsyncpa [#allocation3], 1 }
  0xb1   :  { %248 = vsyncpa [#allocation3 + $0x1], 1 }
  0xb2   :  { %249 = vsyncpa [#allocation4], 1 }
  0xb3   :  { %251 = vsyncpa [#allocation4 + $0x1], 1 }

</bundles_post_ra>
